<compile_context>
chip_gen: v7x
topology: tpu7x:2x2x1
jax: 0.10.0
libtpu: 0.0.40
codegen_flags: <defaults>
</compile_context>

<pallas_src>
import functools

import jax
import jax.numpy as jnp
from jax.experimental import pallas as pl
from jax.experimental.pallas import tpu as pltpu


def _round_up(v, m):
    return ((v + m - 1) // m) * m


def _embed_kernel(x_ref, w_ref, out_ref, *, n_feat, d_pad, d_out_pad, aggr):
    # x_ref  : (TILE_N, F)              int32
    # w_ref  : (F, d_pad, d_out_pad)    float32  (resident: constant index_map)
    # out_ref: (TILE_N, F*d_out_pad)    for 'concat', (TILE_N, d_out_pad) for 'sum'
    tile_n = out_ref.shape[0]
    idx = x_ref[...]                                                     # (TILE_N, F)

    # Hoisted once per N-tile, reused for every feature.
    iota = jax.lax.broadcasted_iota(jnp.int32, (tile_n, d_pad), 1)       # (TILE_N, d_pad)

    if aggr == "sum":
        acc = jnp.zeros((tile_n, d_out_pad), jnp.float32)
        for f in range(n_feat):
            onehot = (iota == idx[:, f:f + 1]).astype(jnp.float32)       # (TILE_N, d_pad)
            acc = acc + jnp.dot(onehot, w_ref[f],
                                preferred_element_type=jnp.float32)
        out_ref[...] = acc                                               # one lane-dense store
    else:  # 'concat'
        for f in range(n_feat):
            onehot = (iota == idx[:, f:f + 1]).astype(jnp.float32)
            emb = jnp.dot(onehot, w_ref[f], preferred_element_type=jnp.float32)
            out_ref[:, pl.ds(f * d_out_pad, d_out_pad)] = emb            # 128-aligned slab


def multi_embedding_pallas(x, tables, aggr="concat", *, tile_n=None):
    """x: (N, F) integer indices; tables: list of (vocab[i], d_out) float32."""
    assert aggr in ("concat", "sum")
    n, n_feat = x.shape
    assert n_feat == len(tables)
    d_out = tables[0].shape[1]

    # Lane-aligned paddings (vocab rows -> K of the matmul, d_out -> lanes of output).
    d_pad = _round_up(max(t.shape[0] for t in tables), 128)
    d_out_pad = _round_up(d_out, 128)

    # Stack + zero-pad tables: (F, d_pad, d_out_pad).  Padding rows/cols never selected
    # / sliced off, so they are numerically inert.
    w = jnp.stack(
        [jnp.pad(t.astype(jnp.float32),
                 ((0, d_pad - t.shape[0]), (0, d_out_pad - d_out)))
         for t in tables]
    )

    # Clip indices to each vocab range so behavior matches jnp.take (clamp) even for
    # invalid inputs; a zero one-hot row would otherwise silently produce zeros.
    limits = jnp.array([t.shape[0] - 1 for t in tables], jnp.int32)
    x = jnp.clip(x.astype(jnp.int32), 0, limits[None, :])

    out_width = n_feat * d_out_pad if aggr == "concat" else d_out_pad

    # Tile N: big enough to amortize the ~0.35us/step grid overhead and hit HBM roofline,
    # small enough that the double-buffered output block + one-hot intermediates stay
    # comfortably inside scoped VMEM on every generation (incl. v7x's 64 MiB physical).
    if tile_n is None:
        tile_n = 1024
        while tile_n > 8 and tile_n * out_width * 4 * 2 > (6 << 20):   # output, double-buffered
            tile_n //= 2
        while tile_n > 8 and tile_n * d_pad * 4 > (4 << 20):           # one-hot / iota
            tile_n //= 2
    tile_n = max(8, min(_round_up(tile_n, 8), _round_up(n, 8)))

    n_pad = _round_up(n, tile_n)
    x_p = jnp.pad(x, ((0, n_pad - n), (0, 0)))

    out = pl.pallas_call(
        functools.partial(_embed_kernel, n_feat=n_feat, d_pad=d_pad,
                          d_out_pad=d_out_pad, aggr=aggr),
        out_shape=jax.ShapeDtypeStruct((n_pad, out_width), jnp.float32),
        grid_spec=pltpu.PrefetchScalarGridSpec(
            num_scalar_prefetch=0,
            grid=(n_pad // tile_n,),
            in_specs=[
                pl.BlockSpec((tile_n, n_feat), lambda i: (i, 0)),          # indices per N-tile
                pl.BlockSpec((n_feat, d_pad, d_out_pad), lambda i: (0, 0, 0)),  # resident tables
            ],
            out_specs=pl.BlockSpec((tile_n, out_width), lambda i: (i, 0)),
        ),
        compiler_params=pltpu.CompilerParams(dimension_semantics=("parallel",)),
    )(x_p, w)

    # Strip row / lane padding.
    if aggr == "concat":
        if d_out_pad == d_out and n_pad == n:
            return out
        return out.reshape(n_pad, n_feat, d_out_pad)[:n, :, :d_out].reshape(n, n_feat * d_out)
    return out[:n, :d_out]


class DiscreteEmbeddingPallas:
    """JAX/Pallas port of DiscreteEmbedding with encoder_name='embedding'."""

    def __init__(self, encoder_name, d_in_features, d_in_encoder, d_out_encoder, **kwargs):
        assert encoder_name == "embedding", "only the 'embedding' encoder is implemented here"
        # TODO(synk): 'linear'/'mlp'/'one_hot_encoder'/'zero_encoder'/atom/bond encoders not ported.
        self.encoder_name = encoder_name
        self.aggr = kwargs.get("aggr", "concat")
        init = kwargs.get("init", None)
        key = jax.random.PRNGKey(kwargs.get("seed", 0))
        self.tables = []
        for d_in in d_in_encoder:
            if init == "zeros":
                w = jnp.zeros((d_in, d_out_encoder), jnp.float32)
            else:
                # xavier_uniform: bound = sqrt(6 / (fan_in + fan_out))
                key, sub = jax.random.split(key)
                bound = (6.0 / (d_in + d_out_encoder)) ** 0.5
                w = jax.random.uniform(
                    sub, (d_in, d_out_encoder), jnp.float32, minval=-bound, maxval=bound
                )
            self.tables.append(w)
        self.d_out = (
            len(d_in_encoder) * d_out_encoder if self.aggr == "concat" else d_out_encoder
        )

    def __call__(self, x):
        if x.ndim == 1:
            x = x[:, None]
        return multi_embedding_pallas(x.astype(jnp.int32), self.tables, self.aggr)


def _reference(x, tables, aggr):
    embs = [jnp.take(t, x[:, i], axis=0) for i, t in enumerate(tables)]
    if aggr == "concat":
        return jnp.concatenate(embs, axis=1)
    return functools.reduce(lambda a, b: a + b, embs)


if __name__ == "__main__":
    key = jax.random.PRNGKey(0)
    d_in_encoder = [5, 7, 3]
    n = 20

    # Per-column integer features in [0, d_in[i]).
    cols = []
    for d in d_in_encoder:
        key, sub = jax.random.split(key)
        cols.append(jax.random.randint(sub, (n, 1), 0, d, dtype=jnp.int32))
    x = jnp.concatenate(cols, axis=1)  # (N, F) int32

    ok = True
    # Exercise both aggregation modes and both aligned / non-aligned embedding widths.
    for d_out_encoder in (96, 128):
        for aggr in ("concat", "sum"):
            mod = DiscreteEmbeddingPallas(
                "embedding", d_in_features=len(d_in_encoder),
                d_in_encoder=d_in_encoder, d_out_encoder=d_out_encoder,
                aggr=aggr, init=None, seed=0,
            )
            out = jax.block_until_ready(mod(x))
            ref = _reference(x, mod.tables, aggr)
            ok = ok and out.shape == (n, mod.d_out)
            ok = ok and bool(jnp.allclose(out, ref, atol=1e-5, rtol=1e-5))

    print("KERNEL_OK" if ok else "KERNEL_MISMATCH")
</pallas_src>

<mosaic_0001>
module attributes {stable_mosaic.version = 11 : i64} {
  func.func @_embed_kernel(%arg0: i32, %arg1: memref<24x3xi32, #tpu.memory_space<vmem>>, %arg2: memref<3x128x128xf32, #tpu.memory_space<vmem>>, %arg3: memref<24x384xf32, #tpu.memory_space<vmem>>) attributes {dimension_semantics = [#tpu.dimension_semantics<parallel>], iteration_bounds = array<i64: 1>, scalar_prefetch = 0 : i64, scratch_operands = 0 : i64, tpu.core_type = #tpu.core_type<tc>, window_params = [{transform_indices = @transform_0, window_bounds = array<i64: 24, 3>}, {pipeline_mode = #tpu.pipeline_mode<synchronous>, transform_indices = @transform_1, window_bounds = array<i64: 3, 128, 128>}, {transform_indices = @transform_2, window_bounds = array<i64: 24, 384>}]} {
    %c0 = arith.constant 0 : index
    %c0_0 = arith.constant 0 : index
    %0 = vector.load %arg1[%c0, %c0_0] : memref<24x3xi32, #tpu.memory_space<vmem>>, vector<24x3xi32>
    %1 = tpu.iota {dimensions = array<i32: 1>} : vector<24x128xi32>
    %2 = vector.extract_strided_slice %0 {offsets = [0, 0], sizes = [24, 1], strides = [1, 1]} : vector<24x3xi32> to vector<24x1xi32>
    %3 = vector.broadcast %2 : vector<24x1xi32> to vector<24x128xi32>
    %4 = arith.cmpi eq, %1, %3 : vector<24x128xi32>
    %5 = arith.extui %4 : vector<24x128xi1> to vector<24x128xi32>
    %6 = arith.sitofp %5 : vector<24x128xi32> to vector<24x128xf32>
    %c0_1 = arith.constant 0 : index
    %c0_2 = arith.constant 0 : index
    %c0_3 = arith.constant 0 : index
    %7 = vector.load %arg2[%c0_1, %c0_2, %c0_3] : memref<3x128x128xf32, #tpu.memory_space<vmem>>, vector<1x128x128xf32>
    %8 = vector.shape_cast %7 : vector<1x128x128xf32> to vector<128x128xf32>
    %cst = arith.constant dense<0.000000e+00> : vector<24x128xf32>
    %9 = tpu.matmul %6, %8, %cst {dimension_numbers = #tpu.dot_dimension_numbers<[1], [0], [0], [1], [0, 0, 1, 1], [], []>} : vector<24x128xf32>, vector<128x128xf32>, vector<24x128xf32> -> vector<24x128xf32>
    %c0_4 = arith.constant 0 : index
    %c0_5 = arith.constant 0 : index
    %10 = vector.load %arg3[%c0_4, %c0_5] : memref<24x384xf32, #tpu.memory_space<vmem>>, vector<24x128xf32>
    tpu.vector_store %arg3[%c0_4, %c0_5], %9 {strides = array<i32>} : memref<24x384xf32, #tpu.memory_space<vmem>>, vector<24x128xf32>,
    %11 = vector.extract_strided_slice %0 {offsets = [0, 1], sizes = [24, 1], strides = [1, 1]} : vector<24x3xi32> to vector<24x1xi32>
    %12 = vector.broadcast %11 : vector<24x1xi32> to vector<24x128xi32>
    %13 = arith.cmpi eq, %1, %12 : vector<24x128xi32>
    %14 = arith.extui %13 : vector<24x128xi1> to vector<24x128xi32>
    %15 = arith.sitofp %14 : vector<24x128xi32> to vector<24x128xf32>
    %c1 = arith.constant 1 : index
    %c0_6 = arith.constant 0 : index
    %c0_7 = arith.constant 0 : index
    %16 = vector.load %arg2[%c1, %c0_6, %c0_7] : memref<3x128x128xf32, #tpu.memory_space<vmem>>, vector<1x128x128xf32>
    %17 = vector.shape_cast %16 : vector<1x128x128xf32> to vector<128x128xf32>
    %cst_8 = arith.constant dense<0.000000e+00> : vector<24x128xf32>
    %18 = tpu.matmul %15, %17, %cst_8 {dimension_numbers = #tpu.dot_dimension_numbers<[1], [0], [0], [1], [0, 0, 1, 1], [], []>} : vector<24x128xf32>, vector<128x128xf32>, vector<24x128xf32> -> vector<24x128xf32>
    %c0_9 = arith.constant 0 : index
    %c128 = arith.constant 128 : index
    %19 = vector.load %arg3[%c0_9, %c128] : memref<24x384xf32, #tpu.memory_space<vmem>>, vector<24x128xf32>
    tpu.vector_store %arg3[%c0_9, %c128], %18 {strides = array<i32>} : memref<24x384xf32, #tpu.memory_space<vmem>>, vector<24x128xf32>,
    %20 = vector.extract_strided_slice %0 {offsets = [0, 2], sizes = [24, 1], strides = [1, 1]} : vector<24x3xi32> to vector<24x1xi32>
    %21 = vector.broadcast %20 : vector<24x1xi32> to vector<24x128xi32>
    %22 = arith.cmpi eq, %1, %21 : vector<24x128xi32>
    %23 = arith.extui %22 : vector<24x128xi1> to vector<24x128xi32>
    %24 = arith.sitofp %23 : vector<24x128xi32> to vector<24x128xf32>
    %c2 = arith.constant 2 : index
    %c0_10 = arith.constant 0 : index
    %c0_11 = arith.constant 0 : index
    %25 = vector.load %arg2[%c2, %c0_10, %c0_11] : memref<3x128x128xf32, #tpu.memory_space<vmem>>, vector<1x128x128xf32>
    %26 = vector.shape_cast %25 : vector<1x128x128xf32> to vector<128x128xf32>
    %cst_12 = arith.constant dense<0.000000e+00> : vector<24x128xf32>
    %27 = tpu.matmul %24, %26, %cst_12 {dimension_numbers = #tpu.dot_dimension_numbers<[1], [0], [0], [1], [0, 0, 1, 1], [], []>} : vector<24x128xf32>, vector<128x128xf32>, vector<24x128xf32> -> vector<24x128xf32>
    %c0_13 = arith.constant 0 : index
    %c256 = arith.constant 256 : index
    %28 = vector.load %arg3[%c0_13, %c256] : memref<24x384xf32, #tpu.memory_space<vmem>>, vector<24x128xf32>
    tpu.vector_store %arg3[%c0_13, %c256], %27 {strides = array<i32>} : memref<24x384xf32, #tpu.memory_space<vmem>>, vector<24x128xf32>,
    return
  }
  func.func @transform_0(%arg0: i32) -> (i32, i32) {
    %c0_i32 = arith.constant 0 : i32
    %c0_i32_0 = arith.constant 0 : i32
    return %arg0, %c0_i32 : i32, i32
  }
  func.func @transform_1(%arg0: i32) -> (i32, i32, i32) {
    %c0_i32 = arith.constant 0 : i32
    %c0_i32_0 = arith.constant 0 : i32
    %c0_i32_1 = arith.constant 0 : i32
    %c0_i32_2 = arith.constant 0 : i32
    return %c0_i32, %c0_i32_0, %c0_i32_1 : i32, i32, i32
  }
  func.func @transform_2(%arg0: i32) -> (i32, i32) {
    %c0_i32 = arith.constant 0 : i32
    %c0_i32_0 = arith.constant 0 : i32
    return %arg0, %c0_i32 : i32, i32
  }
}

</mosaic_0001>

<bundles_post_ra>
// kernel: tpu_custom_call.1
= control target key start
LH: loop header
LB: loop body
LE: loop exit
PB: predicated region body
PF: predicated region fallthrough
CT: control target
= control target key end

     0   :  { %7 = vsyncpa [#allocation3], 0  ;;  %s886_s0 = inlined_call_operand.vmem [shape: s32[24,3], index: 0, kind: input, shape index: {}]   ;;  %s887_s1 = inlined_call_operand.hbm [shape: f32[3,128,128], index: 1, kind: input, shape index: {}]   ;;  %s888_s2 = inlined_call_operand.hbm [shape: f32[24,384], index: 2, kind: output, shape index: {}]  }
   0x1   :  { %8 = vsyncpa [#allocation4], 0  ;;  %s755_s9 = smov [#allocation2]   ;;  %s707_s13 = scalar_lea.hbm %s887_s1, 6144 }
   0x2   :  { %s16_s10 = sshll.u32 %s755_s9, 4  ;;  %p708_p0 = scmp.ne.s32.totalorder %s887_s1, %s707_s13  ;;  %s17_s10 = int_to_ptr.vmem [resolvable:$true] %s16_s10 }
   0x3   :  { %p711_p1 = scmp.lt.u32.totalorder %s707_s13, %s887_s1 }
   0x5   :  { %p713_p2 = pnand %p711_p1, %p708_p0 }
   0x7   :  { %716 = shalt.err (!%p713_p2)
}
   0x8   :  { %s717_s18 = scalar_lea.vmem %s17_s10, 6144  ;;  %p722_p4 = scmp.lt.s32.totalorder %s17_s10, %s17_s10 }
   0x9   :  { %p718_p3 = scmp.ne.s32.totalorder %s17_s10, %s717_s18  ;;  %p723_p5 = scmp.lt.s32.totalorder %s717_s18, %s717_s18 }
   0xb   :  { %p724_p6 = por %p723_p5, %p722_p4 }
   0xd   :  { %p725_p7 = pnand %p724_p6, %p718_p3 }
   0xf   :  { %728 = shalt.err (!%p725_p7)
}
  0x10   :  { %s756_s19 = smov 128   ;;  %s757_s20 = smov 8  }
  0x11   :  { %22 = dma.hbm_to_vmem [thread:$0]  %s887_s1, 6144, %s17_s10, [#allocation3], %s756_s19, %s756_s19, %s757_s20  }
  0x12   :  { %751 = dma.done.wait [#allocation3], 6144  }
  0x13   :  { %752 = vsyncadd [#allocation3], 4294961152  ;;  %v758_v0 = vmov 1   ;;  %v759_v1 = vmov 0.0|0.0   ;;  %v26_v2 = vld [vmem:[%s886_s0] sm:$0xff]  ;;  %v27_v3 = vld [vmem:[%s886_s0 + $0x8] sm:$0xff]  ;;  %v29_v56 = vlaneseq }
  0x14   :  { %700 = vset.pattern.permute.xlu0 %v758_v0  ;;  %702 = vset.pattern.permute.xlu1 %v758_v0  ;;  %v167_v4 = vld [vmem:[#allocation2 + $0x80] sm:$0xff]  ;;  %v168_v5 = vld [vmem:[#allocation2 + $0x88] sm:$0xff]  ;;  %v169_v6 = vld [vmem:[#allocation2 + $0x90] sm:$0xff]  ;;  %vm760_vm0 = vmmov 0   ;;  %v761_v11 = vmov 0.0   ;;  %v762_v16 = vmov 0  }
  0x15   :  { %623 = vmatprep.subr.bf16.mxu1 %v759_v1  ;;  %599 = vmatprep.subr.bf16.mxu0 %v759_v1  ;;  %v624_v7 = vpack.c.bf16 %v168_v5, %v167_v4  ;;  %v170_v8 = vld [vmem:[#allocation2 + $0x98] sm:$0xff]  ;;  %v49_v9 = vld [vmem:[#allocation2] sm:$0xff]  ;;  %v50_v10 = vld [vmem:[#allocation2 + $0x8] sm:$0xff]  ;;  %v763_v30 = vmov 2   ;;  %v826_v59 = vand.u32 127, %v29_v56 }
  0x16   :  { %149 = vperm.xlu0 %700, %v26_v2   ;;  %152 = vperm.xlu1 %702, %v27_v3   ;;  %v600_v12 = vpack.c.bf16 %v50_v10, %v49_v9  ;;  %v627_v13 = vpack.c.bf16 %v170_v8, %v169_v6  ;;  %v51_v14 = vld [vmem:[#allocation2 + $0x10] sm:$0xff]  ;;  %v52_v15 = vld [vmem:[#allocation2 + $0x18] sm:$0xff]  ;;  %v171_v17 = vld [vmem:[#allocation2 + $0xa0] sm:$0xff] }
  0x17   :  { %549 = vmatprep.mubr.msk.f32.mxu1 %vm760_vm0, %v761_v11  ;;  %508 = vmatprep.mubr.msk.f32.mxu0 %vm760_vm0, %v761_v11  ;;  %v172_v18 = vld [vmem:[#allocation2 + $0xa8] sm:$0xff]  ;;  %v28_v19 = vld [vmem:[%s886_s0 + $0x10] sm:$0xff]  ;;  %v603_v20 = vpack.c.bf16 %v52_v15, %v51_v14  ;;  %v174_v23 = vld [vmem:[#allocation2 + $0xb8] sm:$0xff]  ;;  %s765_s0 = smov [#allocation5]  }
  0x18   :  { %625 = vmatpush3.bf16.msra.mxu1 %v624_v7  ;;  %601 = vmatpush3.bf16.msra.mxu0 %v600_v12  ;;  %v630_v21 = vpack.c.bf16 %v172_v18, %v171_v17  ;;  %v173_v22 = vld [vmem:[#allocation2 + $0xb0] sm:$0xff]  ;;  %v53_v24 = vld [vmem:[#allocation2 + $0x20] sm:$0xff]  ;;  %v54_v25 = vld [vmem:[#allocation2 + $0x28] sm:$0xff]  ;;  %s389_s28 = sshll.u32 %s765_s0, 4  ;;  %s390_s28 = int_to_ptr.vmem [resolvable:$true] %s389_s28 }
  0x19   :  { %626 = vmatprep.subr.bf16.mxu1 %v759_v1  ;;  %602 = vmatprep.subr.bf16.mxu0 %v759_v1  ;;  %v633_v26 = vpack.c.bf16 %v174_v23, %v173_v22  ;;  %v606_v27 = vpack.c.bf16 %v54_v25, %v53_v24  ;;  %v175_v28 = vld [vmem:[#allocation2 + $0xc0] sm:$0xff]  ;;  %v176_v29 = vld [vmem:[#allocation2 + $0xc8] sm:$0xff]  ;;  %v55_v31 = vld [vmem:[#allocation2 + $0x30] sm:$0xff]  ;;  %s729_s29 = scalar_lea.vmem %s390_s28, 1152  ;;  %p734_p9 = scmp.lt.s32.totalorder %s390_s28, %s390_s28 }
  0x1a   :  { %701 = vset.pattern.permute.xlu0 %v762_v16  ;;  %703 = vset.pattern.permute.xlu1 %v762_v16  ;;  %v56_v32 = vld [vmem:[#allocation2 + $0x38] sm:$0xff]  ;;  %v636_v33 = vpack.c.bf16 %v176_v29, %v175_v28  ;;  %v177_v35 = vld [vmem:[#allocation2 + $0xd0] sm:$0xff]  ;;  %v57_v37 = vld [vmem:[#allocation2 + $0x40] sm:$0xff]  ;;  %p730_p8 = scmp.ne.s32.totalorder %s390_s28, %s729_s29  ;;  %p735_p10 = scmp.lt.s32.totalorder %s729_s29, %s729_s29 }
  0x1b   :  { %32 = vperm.xlu0 %701, %v26_v2   ;;  %35 = vperm.xlu1 %703, %v27_v3   ;;  %v609_v34 = vpack.c.bf16 %v56_v32, %v55_v31  ;;  %v178_v36 = vld [vmem:[#allocation2 + $0xd8] sm:$0xff]  ;;  %v58_v38 = vld [vmem:[#allocation2 + $0x48] sm:$0xff]  ;;  %v179_v41 = vld [vmem:[#allocation2 + $0xe0] sm:$0xff] }
  0x1c   :  { %628 = vmatpush3.bf16.msra.mxu1 %v627_v13  ;;  %604 = vmatpush3.bf16.msra.mxu0 %v603_v20  ;;  %v639_v39 = vpack.c.bf16 %v178_v36, %v177_v35  ;;  %v612_v40 = vpack.c.bf16 %v58_v38, %v57_v37  ;;  %v180_v42 = vld [vmem:[#allocation2 + $0xe8] sm:$0xff]  ;;  %v59_v43 = vld [vmem:[#allocation2 + $0x50] sm:$0xff]  ;;  %v60_v44 = vld [vmem:[#allocation2 + $0x58] sm:$0xff]  ;;  %p736_p11 = por %p735_p10, %p734_p9 }
  0x1d   :  { %629 = vmatprep.subr.bf16.mxu1 %v759_v1  ;;  %605 = vmatprep.subr.bf16.mxu0 %v759_v1  ;;  %v642_v45 = vpack.c.bf16 %v180_v42, %v179_v41  ;;  %v615_v46 = vpack.c.bf16 %v60_v44, %v59_v43  ;;  %v181_v47 = vld [vmem:[#allocation2 + $0xf0] sm:$0xff]  ;;  %v182_v48 = vld [vmem:[#allocation2 + $0xf8] sm:$0xff]  ;;  %v61_v49 = vld [vmem:[#allocation2 + $0x60] sm:$0xff] }
  0x1e   :  { %v62_v50 = vld [vmem:[#allocation2 + $0x68] sm:$0xff]  ;;  %v645_v51 = vpack.c.bf16 %v182_v48, %v181_v47  ;;  %v63_v53 = vld [vmem:[#allocation2 + $0x70] sm:$0xff]  ;;  %v64_v54 = vld [vmem:[#allocation2 + $0x78] sm:$0xff]  ;;  %p737_p12 = pnand %p736_p11, %p730_p8 }
  0x1f   :  { %38 = vperm.xlu0 %701, %v28_v19   ;;  %704 = vset.pattern.permute.xlu1 %v758_v0  ;;  %v618_v52 = vpack.c.bf16 %v62_v50, %v61_v49  ;;  %v621_v55 = vpack.c.bf16 %v64_v54, %v63_v53  ;;  %v285_v57 = vld [vmem:[#allocation2 + $0x100] sm:$0xff]  ;;  %v286_v58 = vld [vmem:[#allocation2 + $0x108] sm:$0xff]  ;;  %v287_v63 = vld [vmem:[#allocation2 + $0x110] sm:$0xff] }
  0x20   :  { %155 = vperm.xlu1 %704, %v28_v19   ;;  %631 = vmatpush3.bf16.msra.mxu1 %v630_v21  ;;  %v648_v60 = vpack.c.bf16 %v286_v58, %v285_v57  ;;  %v288_v0 = vld [vmem:[#allocation2 + $0x118] sm:$0xff]  ;;  %v289_v4 = vld [vmem:[#allocation2 + $0x120] sm:$0xff]  ;;  %v290_v5 = vld [vmem:[#allocation2 + $0x128] sm:$0xff] }
  0x21   :  { %632 = vmatprep.subr.bf16.mxu1 %v759_v1  ;;  %607 = vmatpush3.bf16.msra.mxu0 %v606_v27  ;;  %v654_v8 = vpack.c.bf16 %v290_v5, %v289_v4  ;;  %v291_v9 = vld [vmem:[#allocation2 + $0x130] sm:$0xff]  ;;  %v292_v10 = vld [vmem:[#allocation2 + $0x138] sm:$0xff]  ;;  %v293_v15 = vld [vmem:[#allocation2 + $0x140] sm:$0xff] }
  0x22   :  { %608 = vmatprep.subr.bf16.mxu0 %v759_v1  ;;  %v657_v14 = vpack.c.bf16 %v292_v10, %v291_v9  ;;  %v294_v16 = vld [vmem:[#allocation2 + $0x148] sm:$0xff]  ;;  %v295_v18 = vld [vmem:[#allocation2 + $0x150] sm:$0xff]  ;;  %v297_v21 = vld [vmem:[#allocation2 + $0x160] sm:$0xff] }
  0x23   :  { %706 = vset.pattern.permute.xlu0 %v763_v30  ;;  %v660_v17 = vpack.c.bf16 %v294_v16, %v293_v15  ;;  %v298_v22 = vld [vmem:[#allocation2 + $0x168] sm:$0xff]  ;;  %v299_v24 = vld [vmem:[#allocation2 + $0x170] sm:$0xff]  ;;  %v300_v25 = vld [vmem:[#allocation2 + $0x178] sm:$0xff] }
  0x24   :  { %705 = vset.pattern.permute.xlu1 %v763_v30  ;;  %267 = vperm.xlu0 %706, %v26_v2   ;;  %v764_v2 = vmov 1.0   ;;  %v666_v23 = vpack.c.bf16 %v298_v22, %v297_v21 }
  0x25   :  { %270 = vperm.xlu1 %705, %v27_v3   ;;  %634 = vmatpush3.bf16.msra.mxu1 %v633_v26  ;;  %v651_v3 = vpack.c.bf16 %v288_v0, %v287_v63  ;;  %v669_v26 = vpack.c.bf16 %v300_v25, %v299_v24 }
  0x26   :  { %635 = vmatprep.subr.bf16.mxu1 %v759_v1  ;;  %610 = vmatpush3.bf16.msra.mxu0 %v609_v34 }
  0x27   :  { %611 = vmatprep.subr.bf16.mxu0 %v759_v1 }
  0x29   :  { %273 = vperm.xlu1 %705, %v28_v19   ;;  %637 = vmatpush3.bf16.msra.mxu1 %v636_v33  ;;  %v296_v19 = vld [vmem:[#allocation2 + $0x158] sm:$0xff] }
  0x2a   :  { %638 = vmatprep.subr.bf16.mxu1 %v759_v1  ;;  %613 = vmatpush3.bf16.msra.mxu0 %v612_v40  ;;  %v663_v20 = vpack.c.bf16 %v296_v19, %v295_v18 }
  0x2b   :  { %614 = vmatprep.subr.bf16.mxu0 %v759_v1 }
  0x2d   :  { %640 = vmatpush3.bf16.msra.mxu1 %v639_v39 }
  0x2e   :  { %641 = vmatprep.subr.bf16.mxu1 %v759_v1  ;;  %616 = vmatpush3.bf16.msra.mxu0 %v615_v46 }
  0x2f   :  { %617 = vmatprep.subr.bf16.mxu0 %v759_v1 }
  0x31   :  { %643 = vmatpush3.bf16.msra.mxu1 %v642_v45 }
  0x32   :  { %644 = vmatprep.subr.bf16.mxu1 %v759_v1  ;;  %619 = vmatpush3.bf16.msra.mxu0 %v618_v52 }
  0x33   :  { %620 = vmatprep.subr.bf16.mxu0 %v759_v1 }
  0x35   :  { %646 = vmatpush3.bf16.msra.mxu1 %v645_v51 }
  0x36   :  { %671 = vmatprep.subr.bf16.mxu1 %v759_v1  ;;  %622 = vmatpush3.bf16.msra.mxu0 %v621_v55 }
  0x37   :  { %647 = vmatprep.subr.bf16.mxu0 %v759_v1 }
  0x95   :  { %v150_v61 = vpop.permute.xlu0 %149  ;;  %v153_v62 = vpop.permute.xlu1 %152 }
  0x96   :  { %vm157_vm1 = vcmp.eq.s32.totalorder %v826_v59, %v150_v61  ;;  %vm158_vm2 = vcmp.eq.s32.totalorder %v826_v59, %v153_v62 }
  0x97   :  { %550 = vmatmul.mubr.msk.f32.vlgmr.msra.gmra.mrb[0].mxu1 %vm157_vm1, %v764_v2 }
  0x98   :  { %679 = vmatpush3.bf16.msra.mxu1 %v648_v60  ;;  %552 = vmatprep.mubr.msk.f32.mxu1 %vm760_vm0, %v761_v11 }
  0x99   :  { %672 = vmatprep.subr.bf16.mxu1 %v759_v1 }
  0x9a   :  { %v33_v6 = vpop.permute.xlu0 %32  ;;  %v36_v7 = vpop.permute.xlu1 %35 }
  0x9b   :  { %vm40_vm3 = vcmp.eq.s32.totalorder %v826_v59, %v33_v6  ;;  %553 = vmatmul.mubr.msk.f32.gmra.mrb[2].mxu1 %vm158_vm2, %v764_v2  ;;  %vm41_vm4 = vcmp.eq.s32.totalorder %v826_v59, %v36_v7 }
  0x9c   :  { %680 = vmatpush3.bf16.msra.mxu1 %v651_v3  ;;  %509 = vmatmul.mubr.msk.f32.vlgmr.msra.gmra.mrb[0].mxu0 %vm40_vm3, %v764_v2 }
  0x9d   :  { %649 = vmatpush3.bf16.msra.mxu0 %v648_v60  ;;  %673 = vmatprep.subr.bf16.mxu1 %v759_v1 }
  0x9e   :  { %511 = vmatprep.mubr.msk.f32.mxu0 %vm760_vm0, %v761_v11  ;;  %650 = vmatprep.subr.bf16.mxu0 %v759_v1  ;;  %v39_v13 = vpop.permute.xlu0 %38 }
  0x9f   :  { %v156_v12 = vpop.permute.xlu1 %155  ;;  %555 = vmatprep.mubr.msk.f32.mxu1 %vm760_vm0, %v761_v11  ;;  %vm42_vm6 = vcmp.eq.s32.totalorder %v826_v59, %v39_v13 }
  0xa0   :  { %681 = vmatpush3.bf16.msra.mxu1 %v654_v8  ;;  %512 = vmatmul.mubr.msk.f32.gmra.mrb[2].mxu0 %vm41_vm4, %v764_v2  ;;  %vm159_vm5 = vcmp.eq.s32.totalorder %v826_v59, %v156_v12 }
  0xa1   :  { %652 = vmatpush3.bf16.msra.mxu0 %v651_v3  ;;  %674 = vmatprep.subr.bf16.mxu1 %v759_v1 }
  0xa2   :  { %514 = vmatprep.mubr.msk.f32.mxu0 %vm760_vm0, %v761_v11  ;;  %653 = vmatprep.subr.bf16.mxu0 %v759_v1 }
  0xa3   :  { %556 = vmatmul.mubr.msk.f32.gmra.mrb[4].mxu1 %vm159_vm5, %v764_v2  ;;  %v268_v28 = vpop.permute.xlu0 %267 }
  0xa4   :  { %682 = vmatpush3.bf16.msra.mxu1 %v657_v14  ;;  %515 = vmatmul.mubr.msk.f32.gmra.mrb[4].mxu0 %vm42_vm6, %v764_v2  ;;  %v271_v27 = vpop.permute.xlu1 %270  ;;  %vm275_vm8 = vcmp.eq.s32.totalorder %v826_v59, %v268_v28 }
  0xa5   :  { %655 = vmatpush3.bf16.msra.mxu0 %v654_v8  ;;  %675 = vmatprep.subr.bf16.mxu1 %v759_v1  ;;  %vm276_vm7 = vcmp.eq.s32.totalorder %v826_v59, %v271_v27 }
  0xa6   :  { %656 = vmatprep.subr.bf16.mxu0 %v759_v1  ;;  %593 = vmatprep.mubr.msk.f32.mxu1 %vm760_vm0, %v761_v11 }
  0xa7   :  { %590 = vmatprep.mubr.msk.f32.mxu0 %vm760_vm0, %v761_v11 }
  0xa8   :  { %683 = vmatpush3.bf16.msra.mxu1 %v660_v17  ;;  %v274_v29 = vpop.permute.xlu1 %273 }
  0xa9   :  { %658 = vmatpush3.bf16.msra.mxu0 %v657_v14  ;;  %676 = vmatprep.subr.bf16.mxu1 %v759_v1  ;;  %vm277_vm9 = vcmp.eq.s32.totalorder %v826_v59, %v274_v29 }
  0xaa   :  { %659 = vmatprep.subr.bf16.mxu0 %v759_v1 }
  0xac   :  { %684 = vmatpush3.bf16.msra.mxu1 %v663_v20 }
  0xad   :  { %661 = vmatpush3.bf16.msra.mxu0 %v660_v17  ;;  %677 = vmatprep.subr.bf16.mxu1 %v759_v1 }
  0xae   :  { %662 = vmatprep.subr.bf16.mxu0 %v759_v1 }
  0xb0   :  { %685 = vmatpush3.bf16.msra.mxu1 %v666_v23 }
  0xb1   :  { %664 = vmatpush3.bf16.msra.mxu0 %v663_v20  ;;  %678 = vmatprep.subr.bf16.mxu1 %v759_v1 }
  0xb2   :  { %665 = vmatprep.subr.bf16.mxu0 %v759_v1 }
  0xb4   :  { %686 = vmatpush3.bf16.msra.mxu1 %v669_v26 }
  0xb5   :  { %667 = vmatpush3.bf16.msra.mxu0 %v666_v23 }
  0xb6   :  { %668 = vmatprep.subr.bf16.mxu0 %v759_v1 }
  0xb7   :  { %594 = vmatmul.mubr.msk.f32.vlgmr.msra.gmra.mrb[6].mxu1 %vm276_vm7, %v764_v2 }
  0xb8   :  { %596 = vmatprep.mubr.msk.f32.mxu1 %vm760_vm0, %v761_v11 }
  0xb9   :  { %670 = vmatpush3.bf16.msra.mxu0 %v669_v26 }
  0xbb   :  { %597 = vmatmul.mubr.msk.f32.gmra.mrb[8].mxu1 %vm277_vm9, %v764_v2 }
  0xbc   :  { %591 = vmatmul.mubr.msk.f32.vlgmr.msra.gmra.mrb[6].mxu0 %vm275_vm8, %v764_v2 }
 0x16a   :  { %v249_v30 = vpop.f32.mrb[0].mxu1 }
 0x16b   :  { %263 = vst [vmem:[#allocation5 + $0x8] sm:$0xff] %v249_v30  ;;  %v551_v31 = vpop.f32.mrb[1].mxu1 }
 0x16e   :  { %v254_v1 = vpop.f32.mrb[2].mxu1 }
 0x16f   :  { %v131_v32 = vpop.f32.mrb[0].mxu0  ;;  %264 = vst [vmem:[#allocation5 + $0x20] sm:$0xff] %v254_v1  ;;  %v554_v33 = vpop.f32.mrb[3].mxu1 }
 0x170   :  { %145 = vst [vmem:[#allocation5] sm:$0xff] %v131_v32  ;;  %v510_v34 = vpop.f32.mrb[1].mxu0 }
 0x173   :  { %v136_v35 = vpop.f32.mrb[2].mxu0 }
 0x174   :  { %146 = vst [vmem:[#allocation5 + $0x18] sm:$0xff] %v136_v35  ;;  %v513_v11 = vpop.f32.mrb[3].mxu0 }
 0x176   :  { %v259_v36 = vpop.f32.mrb[4].mxu1 }
 0x177   :  { %v141_v37 = vpop.f32.mrb[4].mxu0  ;;  %265 = vst [vmem:[#allocation5 + $0x38] sm:$0xff] %v259_v36  ;;  %v557_v38 = vpop.f32.mrb[5].mxu1 }
 0x178   :  { %147 = vst [vmem:[#allocation5 + $0x30] sm:$0xff] %v141_v37  ;;  %v516_v39 = vpop.f32.mrb[5].mxu0 }
 0x18a   :  { %v372_v40 = vpop.f32.mrb[6].mxu1 }
 0x18b   :  { %382 = vst [vmem:[#allocation5 + $0x28] sm:$0xff] %v372_v40  ;;  %v595_v41 = vpop.f32.mrb[7].mxu1 }
 0x18e   :  { %v377_v42 = vpop.f32.mrb[8].mxu1 }
 0x18f   :  { %383 = vst [vmem:[#allocation5 + $0x40] sm:$0xff] %v377_v42  ;;  %v367_v43 = vpop.f32.mrb[6].mxu0  ;;  %v598_v44 = vpop.f32.mrb[9].mxu1 }
 0x190   :  { %381 = vst [vmem:[#allocation5 + $0x10] sm:$0xff] %v367_v43  ;;  %v592_v45 = vpop.f32.mrb[7].mxu0 }
 0x191   :  { %740 = shalt.err (!%p737_p12)
}
 0x192   :  { %s741_s4 = scalar_lea.hbm %s888_s2, 1152 }
 0x193   :  { %p742_p13 = scmp.ne.s32.totalorder %s888_s2, %s741_s4  ;;  %p745_p0 = scmp.lt.u32.totalorder %s741_s4, %s888_s2 }
 0x195   :  { %p747_p1 = pnand %p745_p0, %p742_p13 }
 0x197   :  { %750 = shalt.err (!%p747_p1)
}
 0x198   :  { %s766_s9 = smov 384   ;;  %s767_s10 = smov 24  }
 0x199   :  { %395 = dma.vmem_to_hbm [thread:$0]  %s390_s28, 1152, %s888_s2, [#allocation4], %s766_s9, %s766_s9, %s767_s10  }
 0x19a   :  { %753 = dma.done.wait [#allocation4], 1152  }
 0x19b   :  { %754 = vsyncadd [#allocation4], 4294966144 }
 0x19c   :  { %399 = vsyncpa [#allocation3], 1 }
 0x19d   :  { %400 = vsyncpa [#allocation4], 1 }

</bundles_post_ra>
